<compile_context>
chip_gen: v7x
topology: tpu7x:2x2x1
jax: 0.10.0
libtpu: 0.0.40
codegen_flags: <defaults>
</compile_context>

<pallas_src>
import functools
import math

import jax
import jax.numpy as jnp
from jax.experimental import pallas as pl
from jax.experimental.pallas import tpu as pltpu

NEG_INF = -1e9
VMEM_LIMIT = 48 * 1024 * 1024          # safe on v5e/v6e (128 MiB) and v7x (64 MiB)
_PROJ_BUDGET = 40 * 1024 * 1024        # working-set target for projection kernels
_ATTN_SQ_BUDGET = 12 * 1024 * 1024     # per-tile score/acc budget for attention


def _pick_row_tile(m, d, n_mats):
    """Largest row tile dividing m whose working set fits the VMEM budget.

    cost(t) = double-buffered f32 input + n_mats double-buffered bf16 outputs
              (per row) + n_mats resident (single-buffered) bf16 (d,d) weights.
    """
    fixed = n_mats * d * d * 2
    per_row = (2 * 4 + n_mats * 2 * 2) * d
    for t in (1024, 512, 256, 128, 64, 32, 16, 8):
        if m % t == 0 and fixed + t * per_row <= _PROJ_BUDGET:
            return t
    return 8 if m % 8 == 0 else m


def _pick_seq_tile(n, cap=512):
    for t in (512, 256, 128, 64, 32, 16, 8):
        if t <= cap and n % t == 0:
            return t
    return n


def _pick_sq_tile(sq, h, dk, tk):
    # Bound the in-kernel score block (h, tq, tk) f32 + acc (h, tq, dk) f32.
    for t in (512, 256, 128, 64, 32, 16, 8):
        if sq % t == 0 and h * t * (tk + 2 * dk) * 4 <= _ATTN_SQ_BUDGET:
            return t
    return sq


# ---------------------------------------------------------------------------
# Fused Q/K/V projection (self-attention path): x is read from HBM once per row
# tile, three matmuls + bias adds in one kernel launch, weights VMEM-resident
# and single-buffered.
# ---------------------------------------------------------------------------
def _qkv_proj_kernel(x_ref, wq_ref, wk_ref, wv_ref, bq_ref, bk_ref, bv_ref,
                     q_ref, k_ref, v_ref):
    # TODO(synk): if the upstream producer can hand x in bf16, drop this cast.
    x = x_ref[...].astype(jnp.bfloat16)
    q_ref[...] = (jnp.dot(x, wq_ref[...], preferred_element_type=jnp.float32)
                  + bq_ref[...]).astype(q_ref.dtype)
    k_ref[...] = (jnp.dot(x, wk_ref[...], preferred_element_type=jnp.float32)
                  + bk_ref[...]).astype(k_ref.dtype)
    v_ref[...] = (jnp.dot(x, wv_ref[...], preferred_element_type=jnp.float32)
                  + bv_ref[...]).astype(v_ref.dtype)


def qkv_proj_pallas(x, wq, wk, wv, bq, bk, bv, out_dtype=jnp.bfloat16):
    m, d = x.shape
    tm = _pick_row_tile(m, d, n_mats=3)
    row_spec = pl.BlockSpec((tm, d), lambda i: (i, 0))
    # Constant index_map -> weight stays resident; single buffer (no double-buffer waste).
    w_spec = pl.BlockSpec((d, d), lambda i: (0, 0), pipeline_mode=pl.Buffered(1))
    b_spec = pl.BlockSpec((1, d), lambda i: (0, 0))
    out_sds = jax.ShapeDtypeStruct((m, d), out_dtype)
    return pl.pallas_call(
        _qkv_proj_kernel,
        out_shape=(out_sds, out_sds, out_sds),
        grid=(m // tm,),
        in_specs=[row_spec, w_spec, w_spec, w_spec, b_spec, b_spec, b_spec],
        out_specs=(row_spec, row_spec, row_spec),
        compiler_params=pltpu.CompilerParams(
            dimension_semantics=("parallel",),
            vmem_limit_bytes=VMEM_LIMIT),
    )(x, wq, wk, wv, bq.reshape(1, d), bk.reshape(1, d), bv.reshape(1, d))


# ---------------------------------------------------------------------------
# Generic tiled linear (fallback when query/key/value are distinct tensors).
# ---------------------------------------------------------------------------
def _linear_kernel(x_ref, w_ref, b_ref, o_ref):
    o_ref[...] = (jnp.dot(x_ref[...].astype(jnp.bfloat16), w_ref[...],
                          preferred_element_type=jnp.float32)
                  + b_ref[...]).astype(o_ref.dtype)


def linear_pallas(x, w, b, out_dtype=jnp.bfloat16):
    m, d_in = x.shape
    d_out = w.shape[1]
    tm = _pick_row_tile(m, max(d_in, d_out), n_mats=1)
    return pl.pallas_call(
        _linear_kernel,
        out_shape=jax.ShapeDtypeStruct((m, d_out), out_dtype),
        grid=(m // tm,),
        in_specs=[pl.BlockSpec((tm, d_in), lambda i: (i, 0)),
                  pl.BlockSpec((d_in, d_out), lambda i: (0, 0),
                               pipeline_mode=pl.Buffered(1)),
                  pl.BlockSpec((1, d_out), lambda i: (0, 0))],
        out_specs=pl.BlockSpec((tm, d_out), lambda i: (i, 0)),
        compiler_params=pltpu.CompilerParams(
            dimension_semantics=("parallel",),
            vmem_limit_bytes=VMEM_LIMIT),
    )(x, w, b.reshape(1, d_out))


# ---------------------------------------------------------------------------
# Flash-style attention + fused output projection.
# Grid: (batch "parallel", Sq tiles "parallel", Sk tiles "arbitrary").
# Online softmax carried in VMEM scratch; mask bias built in-kernel from the
# raw mask; output projection finalized on the last Sk step with a single
# K = d_model matmul (heads packed lane-wise == transpose(1,2).view fusion).
# ---------------------------------------------------------------------------
def _make_attn_kernel(scale, has_mask):
    def kernel(*refs):
        if has_mask:
            (q_ref, k_ref, v_ref, mask_ref, wo_ref, bo_ref, o_ref,
             m_sc, l_sc, acc_sc) = refs
        else:
            (q_ref, k_ref, v_ref, wo_ref, bo_ref, o_ref,
             m_sc, l_sc, acc_sc) = refs

        ki = pl.program_id(2)

        @pl.when(ki == 0)
        def _():
            m_sc[...] = jnp.full_like(m_sc, -jnp.inf)
            l_sc[...] = jnp.zeros_like(l_sc)
            acc_sc[...] = jnp.zeros_like(acc_sc)

        q = q_ref[0].astype(jnp.bfloat16)          # (H, tq, dk)
        k = k_ref[0].astype(jnp.bfloat16)          # (H, tk, dk)
        v = v_ref[0].astype(jnp.bfloat16)          # (H, tk, dk)

        # scores + in-kernel additive mask bias (no O(B*S^2) HBM bias tensor).
        s = jnp.einsum("hqd,hkd->hqk", q, k,
                       preferred_element_type=jnp.float32) * scale
        if has_mask:
            bias = jnp.where(mask_ref[0] == 0, jnp.float32(NEG_INF),
                             jnp.float32(0.0))     # (1 or tq, tk)
            s = s + bias[None, :, :]               # broadcast over heads

        # online softmax (f32 throughout)
        m_prev = m_sc[...]
        m_new = jnp.maximum(m_prev, jnp.max(s, axis=-1, keepdims=True))
        alpha = jnp.exp(m_prev - m_new)
        p = jnp.exp(s - m_new)
        l_sc[...] = alpha * l_sc[...] + jnp.sum(p, axis=-1, keepdims=True)
        acc_sc[...] = alpha * acc_sc[...] + jnp.einsum(
            "hqk,hkd->hqd", p.astype(jnp.bfloat16), v,
            preferred_element_type=jnp.float32)
        m_sc[...] = m_new
        # TODO(synk): nn.Dropout(p=0.1) on p_attn is omitted (eval/inference mode).

        @pl.when(ki == pl.num_programs(2) - 1)
        def _():
            ctx = acc_sc[...] * pl.reciprocal(l_sc[...], approx=True)  # (H,tq,dk) f32
            nheads = ctx.shape[0]
            # Exactly ctx.transpose(1,2).view(tq, H*dk): pack heads lane-wise,
            # then ONE matmul with K = d_model (full MXU feed, single drain).
            ctx_c = jnp.concatenate([ctx[i] for i in range(nheads)],
                                    axis=-1).astype(jnp.bfloat16)      # (tq, D)
            out = jnp.dot(ctx_c, wo_ref[...],
                          preferred_element_type=jnp.float32) + bo_ref[...]
            o_ref[0] = out.astype(o_ref.dtype)

    return kernel


def attention_pallas(q, k, v, mask, wo, bo, out_dtype=jnp.float32):
    b, h, sq, dk = q.shape
    sk = k.shape[2]
    d_model = wo.shape[0]

    tk = _pick_seq_tile(sk)
    tq = _pick_sq_tile(sq, h, dk, tk)
    grid = (b, sq // tq, sk // tk)
    has_mask = mask is not None

    in_specs = [
        pl.BlockSpec((1, h, tq, dk), lambda bb, qi, ki: (bb, 0, qi, 0)),
        pl.BlockSpec((1, h, tk, dk), lambda bb, qi, ki: (bb, 0, ki, 0)),
        pl.BlockSpec((1, h, tk, dk), lambda bb, qi, ki: (bb, 0, ki, 0)),
    ]
    inputs = [q, k, v]
    if has_mask:
        mq = mask.shape[1]
        if mq == 1:   # padding-style mask row: DMA only (1,1,tk) per step
            in_specs.append(pl.BlockSpec((1, 1, tk),
                                         lambda bb, qi, ki: (bb, 0, ki)))
        else:         # full (B,Sq,Sk) mask: tile it, never expand to a bias tensor
            in_specs.append(pl.BlockSpec((1, tq, tk),
                                         lambda bb, qi, ki: (bb, qi, ki)))
        inputs.append(mask)
    in_specs += [
        pl.BlockSpec((d_model, d_model), lambda bb, qi, ki: (0, 0),
                     pipeline_mode=pl.Buffered(1)),       # Wo resident, 1 buffer
        pl.BlockSpec((1, d_model), lambda bb, qi, ki: (0, 0)),
    ]
    inputs += [wo, bo.reshape(1, d_model)]

    kernel = _make_attn_kernel(1.0 / math.sqrt(dk), has_mask)
    return pl.pallas_call(
        kernel,
        out_shape=jax.ShapeDtypeStruct((b, sq, d_model), out_dtype),
        grid=grid,
        in_specs=in_specs,
        out_specs=pl.BlockSpec((1, tq, d_model), lambda bb, qi, ki: (bb, qi, 0)),
        scratch_shapes=[pltpu.VMEM((h, tq, 1), jnp.float32),   # running max m
                        pltpu.VMEM((h, tq, 1), jnp.float32),   # running sum l
                        pltpu.VMEM((h, tq, dk), jnp.float32)], # running acc
        compiler_params=pltpu.CompilerParams(
            dimension_semantics=("parallel", "parallel", "arbitrary"),
            vmem_limit_bytes=VMEM_LIMIT),
    )(*inputs)


# ---------------------------------------------------------------------------
# Module forward (MultiHeadedAttn.forward)
# ---------------------------------------------------------------------------
def multi_headed_attn_forward(params, query, key, value, mask, h):
    b, sq, d_model = query.shape
    sk = key.shape[1]
    assert d_model % h == 0
    dk = d_model // h

    if (query is key) and (key is value):
        # Self-attention: one fused QKV kernel (x read once, 1 launch instead of 3).
        x2d = query.reshape(b * sq, d_model)
        q, k, v = qkv_proj_pallas(x2d, params["wq"], params["wk"], params["wv"],
                                  params["bq"], params["bk"], params["bv"])
    else:
        q = linear_pallas(query.reshape(b * sq, d_model), params["wq"], params["bq"])
        k = linear_pallas(key.reshape(b * sk, d_model), params["wk"], params["bk"])
        v = linear_pallas(value.reshape(b * sk, d_model), params["wv"], params["bv"])

    # Replicate the reference's `.view(n_batches, h, -1, d_k)` exactly: a pure
    # row-major reinterpretation (no transpose). Intentionally bug-compatible.
    q4 = q.reshape(b, h, sq, dk)
    k4 = k.reshape(b, h, sk, dk)
    v4 = v.reshape(b, h, sk, dk)

    # masked_fill(mask == 0, -1e9): the raw mask (B, Mq, Sk) is handed to the
    # kernel and converted to a -1e9 additive bias in VMEM (no O(B*S^2) HBM
    # bias, and nothing at all when mask is None).
    if mask is not None:
        mask = jnp.asarray(mask)
        if mask.ndim == 2:
            mask = mask[:, None, :]
        mq = mask.shape[-2]
        assert mq in (1, sq), "mask query dim must be 1 or Sq"
        mask = jnp.broadcast_to(mask, (b, mq, sk)).astype(jnp.float32)

    # attention + fused final Linear (Wo, bo)
    return attention_pallas(q4, k4, v4, mask, params["wo"], params["bo"])


# ---------------------------------------------------------------------------
# Deterministic synthetic parameters (weights bf16 for the MXU, biases f32)
# ---------------------------------------------------------------------------
def make_params(key, d_model):
    ks = jax.random.split(key, 8)

    def w(k):
        return (jax.random.normal(k, (d_model, d_model), jnp.float32)
                * 0.05).astype(jnp.bfloat16)

    def bvec(k):
        return jax.random.normal(k, (d_model,), jnp.float32) * 0.05

    return {
        "wq": w(ks[0]), "wk": w(ks[1]), "wv": w(ks[2]), "wo": w(ks[3]),
        "bq": bvec(ks[4]), "bk": bvec(ks[5]), "bv": bvec(ks[6]), "bo": bvec(ks[7]),
    }


# ---------------------------------------------------------------------------
if __name__ == "__main__":
    B, S, D_MODEL, HEADS = 2, 8, 32, 4

    root = jax.random.PRNGKey(0)
    kp, kx = jax.random.split(root)

    params = make_params(kp, D_MODEL)
    x = jax.random.normal(kx, (B, S, D_MODEL), jnp.float32)

    # Padding-style mask: batch 0 attends to all 8 positions, batch 1 to the
    # first 5 only.  Shape (B, 1, S) -> broadcast over heads and query positions.
    lengths = jnp.array([S, 5], jnp.int32)
    mask = (jnp.arange(S)[None, None, :] < lengths[:, None, None]).astype(jnp.float32)

    # Self-attention usage: query = key = value = x (exercises the fused QKV path).
    fwd = jax.jit(lambda p, xx, m: multi_headed_attn_forward(p, xx, xx, xx, m, HEADS))
    out = jax.block_until_ready(fwd(params, x, mask))

    assert out.shape == (B, S, D_MODEL), out.shape
    assert bool(jnp.all(jnp.isfinite(out)))
    print("KERNEL_OK")
</pallas_src>

<mosaic_0001>
module attributes {stable_mosaic.version = 11 : i64} {
  func.func @_qkv_proj_kernel(%arg0: i32, %arg1: memref<16x32xf32, #tpu.memory_space<vmem>>, %arg2: memref<32x32xbf16, #tpu.memory_space<vmem>>, %arg3: memref<32x32xbf16, #tpu.memory_space<vmem>>, %arg4: memref<32x32xbf16, #tpu.memory_space<vmem>>, %arg5: memref<1x32xf32, #tpu.memory_space<vmem>>, %arg6: memref<1x32xf32, #tpu.memory_space<vmem>>, %arg7: memref<1x32xf32, #tpu.memory_space<vmem>>, %arg8: memref<16x32xbf16, #tpu.memory_space<vmem>>, %arg9: memref<16x32xbf16, #tpu.memory_space<vmem>>, %arg10: memref<16x32xbf16, #tpu.memory_space<vmem>>) attributes {dimension_semantics = [#tpu.dimension_semantics<parallel>], iteration_bounds = array<i64: 1>, scalar_prefetch = 0 : i64, scratch_operands = 0 : i64, tpu.core_type = #tpu.core_type<tc>, window_params = [{transform_indices = @transform_0, window_bounds = array<i64: 16, 32>}, {pipeline_mode = #tpu.pipeline_mode<synchronous>, transform_indices = @transform_1, window_bounds = array<i64: 32, 32>}, {pipeline_mode = #tpu.pipeline_mode<synchronous>, transform_indices = @transform_2, window_bounds = array<i64: 32, 32>}, {pipeline_mode = #tpu.pipeline_mode<synchronous>, transform_indices = @transform_3, window_bounds = array<i64: 32, 32>}, {pipeline_mode = #tpu.pipeline_mode<synchronous>, transform_indices = @transform_4, window_bounds = array<i64: 1, 32>}, {pipeline_mode = #tpu.pipeline_mode<synchronous>, transform_indices = @transform_5, window_bounds = array<i64: 1, 32>}, {pipeline_mode = #tpu.pipeline_mode<synchronous>, transform_indices = @transform_6, window_bounds = array<i64: 1, 32>}, {transform_indices = @transform_7, window_bounds = array<i64: 16, 32>}, {transform_indices = @transform_8, window_bounds = array<i64: 16, 32>}, {transform_indices = @transform_9, window_bounds = array<i64: 16, 32>}]} {
    %c0 = arith.constant 0 : index
    %c0_0 = arith.constant 0 : index
    %0 = vector.load %arg1[%c0, %c0_0] : memref<16x32xf32, #tpu.memory_space<vmem>>, vector<16x32xf32>
    %1 = arith.truncf %0 : vector<16x32xf32> to vector<16x32xbf16>
    %c0_1 = arith.constant 0 : index
    %c0_2 = arith.constant 0 : index
    %2 = vector.load %arg2[%c0_1, %c0_2] : memref<32x32xbf16, #tpu.memory_space<vmem>>, vector<32x32xbf16>
    %cst = arith.constant dense<0.000000e+00> : vector<16x32xf32>
    %3 = tpu.matmul %1, %2, %cst {dimension_numbers = #tpu.dot_dimension_numbers<[1], [0], [0], [1], [0, 0, 1, 1], [], []>} : vector<16x32xbf16>, vector<32x32xbf16>, vector<16x32xf32> -> vector<16x32xf32>
    %c0_3 = arith.constant 0 : index
    %c0_4 = arith.constant 0 : index
    %4 = vector.load %arg5[%c0_3, %c0_4] : memref<1x32xf32, #tpu.memory_space<vmem>>, vector<1x32xf32>
    %5 = vector.broadcast %4 : vector<1x32xf32> to vector<16x32xf32>
    %6 = arith.addf %3, %5 : vector<16x32xf32>
    %7 = arith.truncf %6 : vector<16x32xf32> to vector<16x32xbf16>
    %c0_5 = arith.constant 0 : index
    %c0_6 = arith.constant 0 : index
    %8 = vector.load %arg8[%c0_5, %c0_6] : memref<16x32xbf16, #tpu.memory_space<vmem>>, vector<16x32xbf16>
    tpu.vector_store %arg8[%c0_5, %c0_6], %7 {strides = array<i32>} : memref<16x32xbf16, #tpu.memory_space<vmem>>, vector<16x32xbf16>,
    %c0_7 = arith.constant 0 : index
    %c0_8 = arith.constant 0 : index
    %9 = vector.load %arg3[%c0_7, %c0_8] : memref<32x32xbf16, #tpu.memory_space<vmem>>, vector<32x32xbf16>
    %cst_9 = arith.constant dense<0.000000e+00> : vector<16x32xf32>
    %10 = tpu.matmul %1, %9, %cst_9 {dimension_numbers = #tpu.dot_dimension_numbers<[1], [0], [0], [1], [0, 0, 1, 1], [], []>} : vector<16x32xbf16>, vector<32x32xbf16>, vector<16x32xf32> -> vector<16x32xf32>
    %c0_10 = arith.constant 0 : index
    %c0_11 = arith.constant 0 : index
    %11 = vector.load %arg6[%c0_10, %c0_11] : memref<1x32xf32, #tpu.memory_space<vmem>>, vector<1x32xf32>
    %12 = vector.broadcast %11 : vector<1x32xf32> to vector<16x32xf32>
    %13 = arith.addf %10, %12 : vector<16x32xf32>
    %14 = arith.truncf %13 : vector<16x32xf32> to vector<16x32xbf16>
    %c0_12 = arith.constant 0 : index
    %c0_13 = arith.constant 0 : index
    %15 = vector.load %arg9[%c0_12, %c0_13] : memref<16x32xbf16, #tpu.memory_space<vmem>>, vector<16x32xbf16>
    tpu.vector_store %arg9[%c0_12, %c0_13], %14 {strides = array<i32>} : memref<16x32xbf16, #tpu.memory_space<vmem>>, vector<16x32xbf16>,
    %c0_14 = arith.constant 0 : index
    %c0_15 = arith.constant 0 : index
    %16 = vector.load %arg4[%c0_14, %c0_15] : memref<32x32xbf16, #tpu.memory_space<vmem>>, vector<32x32xbf16>
    %cst_16 = arith.constant dense<0.000000e+00> : vector<16x32xf32>
    %17 = tpu.matmul %1, %16, %cst_16 {dimension_numbers = #tpu.dot_dimension_numbers<[1], [0], [0], [1], [0, 0, 1, 1], [], []>} : vector<16x32xbf16>, vector<32x32xbf16>, vector<16x32xf32> -> vector<16x32xf32>
    %c0_17 = arith.constant 0 : index
    %c0_18 = arith.constant 0 : index
    %18 = vector.load %arg7[%c0_17, %c0_18] : memref<1x32xf32, #tpu.memory_space<vmem>>, vector<1x32xf32>
    %19 = vector.broadcast %18 : vector<1x32xf32> to vector<16x32xf32>
    %20 = arith.addf %17, %19 : vector<16x32xf32>
    %21 = arith.truncf %20 : vector<16x32xf32> to vector<16x32xbf16>
    %c0_19 = arith.constant 0 : index
    %c0_20 = arith.constant 0 : index
    %22 = vector.load %arg10[%c0_19, %c0_20] : memref<16x32xbf16, #tpu.memory_space<vmem>>, vector<16x32xbf16>
    tpu.vector_store %arg10[%c0_19, %c0_20], %21 {strides = array<i32>} : memref<16x32xbf16, #tpu.memory_space<vmem>>, vector<16x32xbf16>,
    return
  }
  func.func @transform_0(%arg0: i32) -> (i32, i32) {
    %c0_i32 = arith.constant 0 : i32
    %c0_i32_0 = arith.constant 0 : i32
    return %arg0, %c0_i32 : i32, i32
  }
  func.func @transform_1(%arg0: i32) -> (i32, i32) {
    %c0_i32 = arith.constant 0 : i32
    %c0_i32_0 = arith.constant 0 : i32
    %c0_i32_1 = arith.constant 0 : i32
    return %c0_i32, %c0_i32_0 : i32, i32
  }
  func.func @transform_2(%arg0: i32) -> (i32, i32) {
    %c0_i32 = arith.constant 0 : i32
    %c0_i32_0 = arith.constant 0 : i32
    %c0_i32_1 = arith.constant 0 : i32
    return %c0_i32, %c0_i32_0 : i32, i32
  }
  func.func @transform_3(%arg0: i32) -> (i32, i32) {
    %c0_i32 = arith.constant 0 : i32
    %c0_i32_0 = arith.constant 0 : i32
    %c0_i32_1 = arith.constant 0 : i32
    return %c0_i32, %c0_i32_0 : i32, i32
  }
  func.func @transform_4(%arg0: i32) -> (i32, i32) {
    %c0_i32 = arith.constant 0 : i32
    %c0_i32_0 = arith.constant 0 : i32
    %c0_i32_1 = arith.constant 0 : i32
    return %c0_i32, %c0_i32_0 : i32, i32
  }
  func.func @transform_5(%arg0: i32) -> (i32, i32) {
    %c0_i32 = arith.constant 0 : i32
    %c0_i32_0 = arith.constant 0 : i32
    %c0_i32_1 = arith.constant 0 : i32
    return %c0_i32, %c0_i32_0 : i32, i32
  }
  func.func @transform_6(%arg0: i32) -> (i32, i32) {
    %c0_i32 = arith.constant 0 : i32
    %c0_i32_0 = arith.constant 0 : i32
    %c0_i32_1 = arith.constant 0 : i32
    return %c0_i32, %c0_i32_0 : i32, i32
  }
  func.func @transform_7(%arg0: i32) -> (i32, i32) {
    %c0_i32 = arith.constant 0 : i32
    %c0_i32_0 = arith.constant 0 : i32
    return %arg0, %c0_i32 : i32, i32
  }
  func.func @transform_8(%arg0: i32) -> (i32, i32) {
    %c0_i32 = arith.constant 0 : i32
    %c0_i32_0 = arith.constant 0 : i32
    return %arg0, %c0_i32 : i32, i32
  }
  func.func @transform_9(%arg0: i32) -> (i32, i32) {
    %c0_i32 = arith.constant 0 : i32
    %c0_i32_0 = arith.constant 0 : i32
    return %arg0, %c0_i32 : i32, i32
  }
}

module attributes {stable_mosaic.version = 11 : i64} {
  func.func @kernel(%arg0: i32, %arg1: i32, %arg2: i32, %arg3: memref<1x4x8x8xbf16, #tpu.memory_space<vmem>>, %arg4: memref<1x4x8x8xbf16, #tpu.memory_space<vmem>>, %arg5: memref<1x4x8x8xbf16, #tpu.memory_space<vmem>>, %arg6: memref<1x1x8xf32, #tpu.memory_space<vmem>>, %arg7: memref<32x32xbf16, #tpu.memory_space<vmem>>, %arg8: memref<1x32xf32, #tpu.memory_space<vmem>>, %arg9: memref<1x8x32xf32, #tpu.memory_space<vmem>>, %arg10: memref<4x8x1xf32, #tpu.memory_space<vmem>>, %arg11: memref<4x8x1xf32, #tpu.memory_space<vmem>>, %arg12: memref<4x8x8xf32, #tpu.memory_space<vmem>>) attributes {dimension_semantics = [#tpu.dimension_semantics<parallel>, #tpu.dimension_semantics<parallel>, #tpu.dimension_semantics<arbitrary>], iteration_bounds = array<i64: 2, 1, 1>, scalar_prefetch = 0 : i64, scratch_operands = 3 : i64, tpu.core_type = #tpu.core_type<tc>, window_params = [{transform_indices = @transform_0, window_bounds = array<i64: 1, 4, 8, 8>}, {transform_indices = @transform_1, window_bounds = array<i64: 1, 4, 8, 8>}, {transform_indices = @transform_2, window_bounds = array<i64: 1, 4, 8, 8>}, {transform_indices = @transform_3, window_bounds = array<i64: 1, 1, 8>}, {pipeline_mode = #tpu.pipeline_mode<synchronous>, transform_indices = @transform_4, window_bounds = array<i64: 32, 32>}, {pipeline_mode = #tpu.pipeline_mode<synchronous>, transform_indices = @transform_5, window_bounds = array<i64: 1, 32>}, {transform_indices = @transform_6, window_bounds = array<i64: 1, 8, 32>}]} {
    %c0_i32 = arith.constant 0 : i32
    %0 = arith.cmpi eq, %arg2, %c0_i32 : i32
    %1 = arith.extui %0 : i1 to i32
    %c0_i32_0 = arith.constant 0 : i32
    %2 = arith.cmpi ne, %1, %c0_i32_0 : i32
    scf.if %2 {
      %cst_42 = arith.constant 0xFF800000 : f32
      %48 = vector.broadcast %cst_42 : f32 to vector<4x8x1xf32>
      %c0_43 = arith.constant 0 : index
      %c0_44 = arith.constant 0 : index
      %c0_45 = arith.constant 0 : index
      %49 = vector.load %arg10[%c0_43, %c0_44, %c0_45] : memref<4x8x1xf32, #tpu.memory_space<vmem>>, vector<4x8x1xf32>
      tpu.vector_store %arg10[%c0_43, %c0_44, %c0_45], %48 {strides = array<i32>} : memref<4x8x1xf32, #tpu.memory_space<vmem>>, vector<4x8x1xf32>,
      %cst_46 = arith.constant 0.000000e+00 : f32
      %50 = vector.broadcast %cst_46 : f32 to vector<4x8x1xf32>
      %c0_47 = arith.constant 0 : index
      %c0_48 = arith.constant 0 : index
      %c0_49 = arith.constant 0 : index
      %51 = vector.load %arg11[%c0_47, %c0_48, %c0_49] : memref<4x8x1xf32, #tpu.memory_space<vmem>>, vector<4x8x1xf32>
      tpu.vector_store %arg11[%c0_47, %c0_48, %c0_49], %50 {strides = array<i32>} : memref<4x8x1xf32, #tpu.memory_space<vmem>>, vector<4x8x1xf32>,
      %cst_50 = arith.constant 0.000000e+00 : f32
      %52 = vector.broadcast %cst_50 : f32 to vector<4x8x8xf32>
      %c0_51 = arith.constant 0 : index
      %c0_52 = arith.constant 0 : index
      %c0_53 = arith.constant 0 : index
      %53 = vector.load %arg12[%c0_51, %c0_52, %c0_53] : memref<4x8x8xf32, #tpu.memory_space<vmem>>, vector<4x8x8xf32>
      tpu.vector_store %arg12[%c0_51, %c0_52, %c0_53], %52 {strides = array<i32>} : memref<4x8x8xf32, #tpu.memory_space<vmem>>, vector<4x8x8xf32>,
    } else {
    }
    %c0 = arith.constant 0 : index
    %c0_1 = arith.constant 0 : index
    %c0_2 = arith.constant 0 : index
    %c0_3 = arith.constant 0 : index
    %3 = vector.load %arg3[%c0, %c0_1, %c0_2, %c0_3] : memref<1x4x8x8xbf16, #tpu.memory_space<vmem>>, vector<1x4x8x8xbf16>
    %4 = vector.shape_cast %3 : vector<1x4x8x8xbf16> to vector<4x8x8xbf16>
    %c0_4 = arith.constant 0 : index
    %c0_5 = arith.constant 0 : index
    %c0_6 = arith.constant 0 : index
    %c0_7 = arith.constant 0 : index
    %5 = vector.load %arg4[%c0_4, %c0_5, %c0_6, %c0_7] : memref<1x4x8x8xbf16, #tpu.memory_space<vmem>>, vector<1x4x8x8xbf16>
    %6 = vector.shape_cast %5 : vector<1x4x8x8xbf16> to vector<4x8x8xbf16>
    %c0_8 = arith.constant 0 : index
    %c0_9 = arith.constant 0 : index
    %c0_10 = arith.constant 0 : index
    %c0_11 = arith.constant 0 : index
    %7 = vector.load %arg5[%c0_8, %c0_9, %c0_10, %c0_11] : memref<1x4x8x8xbf16, #tpu.memory_space<vmem>>, vector<1x4x8x8xbf16>
    %8 = vector.shape_cast %7 : vector<1x4x8x8xbf16> to vector<4x8x8xbf16>
    "tpu.trace_start"() <{level = 10 : i32, message = "hqd,hkd->hqk"}> : () -> ()
    %cst = arith.constant dense<0.000000e+00> : vector<4x8x8xf32>
    %9 = tpu.matmul %4, %6, %cst {dimension_numbers = #tpu.dot_dimension_numbers<[2], [2], [1], [1], [0, 0, 0, 1, 1, 1], [0], [0]>} : vector<4x8x8xbf16>, vector<4x8x8xbf16>, vector<4x8x8xf32> -> vector<4x8x8xf32>
    "tpu.trace_stop"() : () -> ()
    %cst_12 = arith.constant 0.353553385 : f32
    %10 = vector.broadcast %cst_12 : f32 to vector<4x8x8xf32>
    %11 = arith.mulf %9, %10 : vector<4x8x8xf32>
    %c0_13 = arith.constant 0 : index
    %c0_14 = arith.constant 0 : index
    %c0_15 = arith.constant 0 : index
    %12 = vector.load %arg6[%c0_13, %c0_14, %c0_15] : memref<1x1x8xf32, #tpu.memory_space<vmem>>, vector<1x1x8xf32>
    %13 = vector.shape_cast %12 : vector<1x1x8xf32> to vector<1x8xf32>
    %cst_16 = arith.constant 0.000000e+00 : f32
    %14 = vector.broadcast %cst_16 : f32 to vector<1x8xf32>
    %15 = arith.cmpf oeq, %13, %14 : vector<1x8xf32>
    %cst_17 = arith.constant -1.000000e+09 : f32
    %cst_18 = arith.constant 0.000000e+00 : f32
    %16 = vector.broadcast %cst_17 : f32 to vector<1x8xf32>
    %17 = vector.broadcast %cst_18 : f32 to vector<1x8xf32>
    %18 = arith.select %15, %16, %17 : vector<1x8xi1>, vector<1x8xf32>
    %19 = vector.shape_cast %18 : vector<1x8xf32> to vector<1x1x8xf32>
    %20 = vector.broadcast %19 : vector<1x1x8xf32> to vector<4x8x8xf32>
    %21 = arith.addf %11, %20 : vector<4x8x8xf32>
    %c0_19 = arith.constant 0 : index
    %c0_20 = arith.constant 0 : index
    %c0_21 = arith.constant 0 : index
    %22 = vector.load %arg10[%c0_19, %c0_20, %c0_21] : memref<4x8x1xf32, #tpu.memory_space<vmem>>, vector<4x8x1xf32>
    %cst_22 = arith.constant dense<0xFF800000> : vector<4x8xf32>
    %23 = vector.multi_reduction <maximumf>, %21, %cst_22 [2] : vector<4x8x8xf32> to vector<4x8xf32>
    %24 = vector.shape_cast %23 : vector<4x8xf32> to vector<4x8x1xf32>
    %25 = arith.maximumf %22, %24 : vector<4x8x1xf32>
    %26 = arith.subf %22, %25 : vector<4x8x1xf32>
    %27 = math.exp %26 : vector<4x8x1xf32>
    %28 = vector.broadcast %25 : vector<4x8x1xf32> to vector<4x8x8xf32>
    %29 = arith.subf %21, %28 : vector<4x8x8xf32>
    %30 = math.exp %29 : vector<4x8x8xf32>
    %c0_23 = arith.constant 0 : index
    %c0_24 = arith.constant 0 : index
    %c0_25 = arith.constant 0 : index
    %31 = vector.load %arg11[%c0_23, %c0_24, %c0_25] : memref<4x8x1xf32, #tpu.memory_space<vmem>>, vector<4x8x1xf32>
    %32 = arith.mulf %27, %31 : vector<4x8x1xf32>
    %cst_26 = arith.constant dense<0.000000e+00> : vector<4x8xf32>
    %33 = vector.multi_reduction <add>, %30, %cst_26 [2] : vector<4x8x8xf32> to vector<4x8xf32>
    %34 = vector.shape_cast %33 : vector<4x8xf32> to vector<4x8x1xf32>
    %35 = arith.addf %32, %34 : vector<4x8x1xf32>
    %c0_27 = arith.constant 0 : index
    %c0_28 = arith.constant 0 : index
    %c0_29 = arith.constant 0 : index
    %36 = vector.load %arg11[%c0_27, %c0_28, %c0_29] : memref<4x8x1xf32, #tpu.memory_space<vmem>>, vector<4x8x1xf32>
    tpu.vector_store %arg11[%c0_27, %c0_28, %c0_29], %35 {strides = array<i32>} : memref<4x8x1xf32, #tpu.memory_space<vmem>>, vector<4x8x1xf32>,
    %c0_30 = arith.constant 0 : index
    %c0_31 = arith.constant 0 : index
    %c0_32 = arith.constant 0 : index
    %37 = vector.load %arg12[%c0_30, %c0_31, %c0_32] : memref<4x8x8xf32, #tpu.memory_space<vmem>>, vector<4x8x8xf32>
    %38 = vector.broadcast %27 : vector<4x8x1xf32> to vector<4x8x8xf32>
    %39 = arith.mulf %38, %37 : vector<4x8x8xf32>
    %40 = arith.truncf %30 : vector<4x8x8xf32> to vector<4x8x8xbf16>
    "tpu.trace_start"() <{level = 10 : i32, message = "hqk,hkd->hqd"}> : () -> ()
    %cst_33 = arith.constant dense<0.000000e+00> : vector<4x8x8xf32>
    %41 = tpu.matmul %40, %8, %cst_33 {dimension_numbers = #tpu.dot_dimension_numbers<[2], [1], [1], [2], [0, 0, 0, 1, 1, 2], [0], [0]>} : vector<4x8x8xbf16>, vector<4x8x8xbf16>, vector<4x8x8xf32> -> vector<4x8x8xf32>
    "tpu.trace_stop"() : () -> ()
    %42 = arith.addf %39, %41 : vector<4x8x8xf32>
    %c0_34 = arith.constant 0 : index
    %c0_35 = arith.constant 0 : index
    %c0_36 = arith.constant 0 : index
    %43 = vector.load %arg12[%c0_34, %c0_35, %c0_36] : memref<4x8x8xf32, #tpu.memory_space<vmem>>, vector<4x8x8xf32>
    tpu.vector_store %arg12[%c0_34, %c0_35, %c0_36], %42 {strides = array<i32>} : memref<4x8x8xf32, #tpu.memory_space<vmem>>, vector<4x8x8xf32>,
    %c0_37 = arith.constant 0 : index
    %c0_38 = arith.constant 0 : index
    %c0_39 = arith.constant 0 : index
    %44 = vector.load %arg10[%c0_37, %c0_38, %c0_39] : memref<4x8x1xf32, #tpu.memory_space<vmem>>, vector<4x8x1xf32>
    tpu.vector_store %arg10[%c0_37, %c0_38, %c0_39], %25 {strides = array<i32>} : memref<4x8x1xf32, #tpu.memory_space<vmem>>, vector<4x8x1xf32>,
    %c0_i32_40 = arith.constant 0 : i32
    %45 = arith.cmpi eq, %arg2, %c0_i32_40 : i32
    %46 = arith.extui %45 : i1 to i32
    %c0_i32_41 = arith.constant 0 : i32
    %47 = arith.cmpi ne, %46, %c0_i32_41 : i32
    scf.if %47 {
      %c0_42 = arith.constant 0 : index
      %c0_43 = arith.constant 0 : index
      %c0_44 = arith.constant 0 : index
      %48 = vector.load %arg12[%c0_42, %c0_43, %c0_44] : memref<4x8x8xf32, #tpu.memory_space<vmem>>, vector<4x8x8xf32>
      %c0_45 = arith.constant 0 : index
      %c0_46 = arith.constant 0 : index
      %c0_47 = arith.constant 0 : index
      %49 = vector.load %arg11[%c0_45, %c0_46, %c0_47] : memref<4x8x1xf32, #tpu.memory_space<vmem>>, vector<4x8x1xf32>
      %50 = tpu.reciprocal %49 {approx = true} : vector<4x8x1xf32> -> vector<4x8x1xf32>
      %51 = vector.broadcast %50 : vector<4x8x1xf32> to vector<4x8x8xf32>
      %52 = arith.mulf %48, %51 : vector<4x8x8xf32>
      %53 = vector.extract_strided_slice %52 {offsets = [0, 0, 0], sizes = [1, 8, 8], strides = [1, 1, 1]} : vector<4x8x8xf32> to vector<1x8x8xf32>
      %54 = vector.shape_cast %53 : vector<1x8x8xf32> to vector<8x8xf32>
      %55 = vector.extract_strided_slice %52 {offsets = [1, 0, 0], sizes = [1, 8, 8], strides = [1, 1, 1]} : vector<4x8x8xf32> to vector<1x8x8xf32>
      %56 = vector.shape_cast %55 : vector<1x8x8xf32> to vector<8x8xf32>
      %57 = vector.extract_strided_slice %52 {offsets = [2, 0, 0], sizes = [1, 8, 8], strides = [1, 1, 1]} : vector<4x8x8xf32> to vector<1x8x8xf32>
      %58 = vector.shape_cast %57 : vector<1x8x8xf32> to vector<8x8xf32>
      %59 = vector.extract_strided_slice %52 {offsets = [3, 0, 0], sizes = [1, 8, 8], strides = [1, 1, 1]} : vector<4x8x8xf32> to vector<1x8x8xf32>
      %60 = vector.shape_cast %59 : vector<1x8x8xf32> to vector<8x8xf32>
      %61 = tpu.concatenate %54, %56, %58, %60 in 1 : vector<8x8xf32>, vector<8x8xf32>, vector<8x8xf32>, vector<8x8xf32> -> vector<8x32xf32>
      %62 = arith.truncf %61 : vector<8x32xf32> to vector<8x32xbf16>
      %c0_48 = arith.constant 0 : index
      %c0_49 = arith.constant 0 : index
      %63 = vector.load %arg7[%c0_48, %c0_49] : memref<32x32xbf16, #tpu.memory_space<vmem>>, vector<32x32xbf16>
      %cst_50 = arith.constant dense<0.000000e+00> : vector<8x32xf32>
      %64 = tpu.matmul %62, %63, %cst_50 {dimension_numbers = #tpu.dot_dimension_numbers<[1], [0], [0], [1], [0, 0, 1, 1], [], []>} : vector<8x32xbf16>, vector<32x32xbf16>, vector<8x32xf32> -> vector<8x32xf32>
      %c0_51 = arith.constant 0 : index
      %c0_52 = arith.constant 0 : index
      %65 = vector.load %arg8[%c0_51, %c0_52] : memref<1x32xf32, #tpu.memory_space<vmem>>, vector<1x32xf32>
      %66 = vector.broadcast %65 : vector<1x32xf32> to vector<8x32xf32>
      %67 = arith.addf %64, %66 : vector<8x32xf32>
      %c0_53 = arith.constant 0 : index
      %c0_54 = arith.constant 0 : index
      %c0_55 = arith.constant 0 : index
      %68 = vector.load %arg9[%c0_53, %c0_54, %c0_55] : memref<1x8x32xf32, #tpu.memory_space<vmem>>, vector<1x8x32xf32>
      %69 = vector.shape_cast %68 : vector<1x8x32xf32> to vector<8x32xf32>
      %70 = vector.shape_cast %67 : vector<8x32xf32> to vector<1x8x32xf32>
      tpu.vector_store %arg9[%c0_53, %c0_54, %c0_55], %70 {strides = array<i32>} : memref<1x8x32xf32, #tpu.memory_space<vmem>>, vector<1x8x32xf32>,
    } else {
    }
    return
  }
  func.func @transform_0(%arg0: i32, %arg1: i32, %arg2: i32) -> (i32, i32, i32, i32) {
    %c0_i32 = arith.constant 0 : i32
    %c0_i32_0 = arith.constant 0 : i32
    %c0_i32_1 = arith.constant 0 : i32
    return %arg0, %c0_i32, %arg1, %c0_i32_0 : i32, i32, i32, i32
  }
  func.func @transform_1(%arg0: i32, %arg1: i32, %arg2: i32) -> (i32, i32, i32, i32) {
    %c0_i32 = arith.constant 0 : i32
    %c0_i32_0 = arith.constant 0 : i32
    %c0_i32_1 = arith.constant 0 : i32
    return %arg0, %c0_i32, %arg2, %c0_i32_0 : i32, i32, i32, i32
  }
  func.func @transform_2(%arg0: i32, %arg1: i32, %arg2: i32) -> (i32, i32, i32, i32) {
    %c0_i32 = arith.constant 0 : i32
    %c0_i32_0 = arith.constant 0 : i32
    %c0_i32_1 = arith.constant 0 : i32
    return %arg0, %c0_i32, %arg2, %c0_i32_0 : i32, i32, i32, i32
  }
  func.func @transform_3(%arg0: i32, %arg1: i32, %arg2: i32) -> (i32, i32, i32) {
    %c0_i32 = arith.constant 0 : i32
    %c0_i32_0 = arith.constant 0 : i32
    return %arg0, %c0_i32, %arg2 : i32, i32, i32
  }
  func.func @transform_4(%arg0: i32, %arg1: i32, %arg2: i32) -> (i32, i32) {
    %c0_i32 = arith.constant 0 : i32
    %c0_i32_0 = arith.constant 0 : i32
    %c0_i32_1 = arith.constant 0 : i32
    return %c0_i32, %c0_i32_0 : i32, i32
  }
  func.func @transform_5(%arg0: i32, %arg1: i32, %arg2: i32) -> (i32, i32) {
    %c0_i32 = arith.constant 0 : i32
    %c0_i32_0 = arith.constant 0 : i32
    %c0_i32_1 = arith.constant 0 : i32
    return %c0_i32, %c0_i32_0 : i32, i32
  }
  func.func @transform_6(%arg0: i32, %arg1: i32, %arg2: i32) -> (i32, i32, i32) {
    %c0_i32 = arith.constant 0 : i32
    %c0_i32_0 = arith.constant 0 : i32
    return %arg0, %arg1, %c0_i32 : i32, i32, i32
  }
}

</mosaic_0001>

<bundles_post_ra>
// kernel: _lambda_.2
= control target key start
LH: loop header
LB: loop body
LE: loop exit
PB: predicated region body
PF: predicated region fallthrough
CT: control target
= control target key end

     0   :  { %15 = vsyncpa [#allocation3], 0  ;;  %s598_s0 = inlined_call_operand.vmem [shape: f32[16,32], index: 0, kind: input, shape index: {}]   ;;  %s599_s1 = inlined_call_operand.vmem [shape: bf16[32,32], index: 1, kind: input, shape index: {}]   ;;  %s600_s2 = inlined_call_operand.hbm [shape: bf16[32,32], index: 2, kind: input, shape index: {}]   ;;  %s601_s3 = inlined_call_operand.hbm [shape: bf16[32,32], index: 3, kind: input, shape index: {}]   ;;  %s602_s4 = inlined_call_operand.vmem [shape: f32[1,32], index: 4, kind: input, shape index: {}]   ;;  %s603_s5 = inlined_call_operand.vmem [shape: f32[1,32], index: 5, kind: input, shape index: {}]   ;;  %s604_s6 = inlined_call_operand.hbm [shape: f32[1,32], index: 6, kind: input, shape index: {}]   ;;  %s605_s7 = inlined_call_operand.vmem [shape: bf16[16,32], index: 7, kind: output, shape index: {0}]   ;;  %s606_s8 = inlined_call_operand.vmem [shape: bf16[16,32], index: 8, kind: output, shape index: {1}]   ;;  %s607_s9 = inlined_call_operand.vmem [shape: bf16[16,32], index: 9, kind: output, shape index: {2}]  }
   0x1   :  { %16 = vsyncpa [#allocation5], 0  ;;  %s453_s30 = smov [#allocation4]   ;;  %s454_s11 = smov [#allocation2]  }
   0x2   :  { %s38_s10 = sshll.u32 %s453_s30, 4  ;;  %s26_s12 = sshll.u32 %s454_s11, 4  ;;  %s39_s10 = int_to_ptr.vmem [resolvable:$true] %s38_s10  ;;  %s510_s12 = int_to_ptr.vmem [resolvable:$true] %s26_s12 }
   0x3   :  { %s383_s15 = scalar_lea.hbm %s601_s3, 256 }
   0x4   :  { %p384_p0 = scmp.ne.s32.totalorder %s601_s3, %s383_s15  ;;  %p387_p1 = scmp.lt.u32.totalorder %s383_s15, %s601_s3 }
   0x6   :  { %p389_p2 = pnand %p387_p1, %p384_p0 }
   0x8   :  { %392 = shalt.err (!%p389_p2)
}
   0x9   :  { %s393_s20 = scalar_lea.vmem %s39_s10, 256  ;;  %p398_p4 = scmp.lt.s32.totalorder %s39_s10, %s39_s10 }
   0xa   :  { %p394_p3 = scmp.ne.s32.totalorder %s39_s10, %s393_s20  ;;  %p399_p5 = scmp.lt.s32.totalorder %s393_s20, %s393_s20 }
   0xc   :  { %p400_p6 = por %p399_p5, %p398_p4 }
   0xe   :  { %p401_p7 = pnand %p400_p6, %p394_p3 }
  0x10   :  { %404 = shalt.err (!%p401_p7)
}
  0x11   :  { %s455_s21 = smov 64   ;;  %s456_s22 = smov 4  }
  0x12   :  { %44 = dma.hbm_to_vmem [thread:$0]  %s601_s3, 256, %s39_s10, [#allocation5], %s455_s21, %s455_s21, %s456_s22  }
  0x13   :  { %s405_s27 = scalar_lea.hbm %s600_s2, 256 }
  0x14   :  { %p406_p8 = scmp.ne.s32.totalorder %s600_s2, %s405_s27  ;;  %p409_p9 = scmp.lt.u32.totalorder %s405_s27, %s600_s2 }
  0x16   :  { %p411_p10 = pnand %p409_p9, %p406_p8 }
  0x18   :  { %414 = shalt.err (!%p411_p10)
}
  0x19   :  { %s415_s13 = scalar_lea.vmem %s510_s12, 256  ;;  %p420_p12 = scmp.lt.s32.totalorder %s510_s12, %s510_s12 }
  0x1a   :  { %p416_p11 = scmp.ne.s32.totalorder %s510_s12, %s415_s13  ;;  %p421_p13 = scmp.lt.s32.totalorder %s415_s13, %s415_s13 }
  0x1c   :  { %p422_p0 = por %p421_p13, %p420_p12 }
  0x1e   :  { %p423_p1 = pnand %p422_p0, %p416_p11 }
  0x20   :  { %426 = shalt.err (!%p423_p1)
}
  0x21   :  { %32 = dma.hbm_to_vmem [thread:$0]  %s600_s2, 256, %s510_s12, [#allocation3], %s455_s21, %s455_s21, %s456_s22  }
  0x22   :  { %s457_s14 = smov [#allocation6]   ;;  %s427_s18 = scalar_lea.hbm %s604_s6, 16 }
  0x23   :  { %s55_s15 = sshll.u32 %s457_s14, 4  ;;  %p428_p2 = scmp.ne.s32.totalorder %s604_s6, %s427_s18  ;;  %s56_s15 = int_to_ptr.vmem [resolvable:$true] %s55_s15 }
  0x24   :  { %p431_p3 = scmp.lt.u32.totalorder %s427_s18, %s604_s6 }
  0x26   :  { %p433_p4 = pnand %p431_p3, %p428_p2 }
  0x28   :  { %436 = shalt.err (!%p433_p4)
}
  0x29   :  { %s437_s25 = scalar_lea.vmem %s56_s15, 16  ;;  %s441_s2 = scalar_lea.vmem %s56_s15, 32 }
  0x2a   :  { %p438_p5 = scmp.ne.s32.totalorder %s56_s15, %s437_s25  ;;  %p442_p6 = scmp.lt.s32.totalorder %s56_s15, %s56_s15 }
  0x2b   :  { %p443_p7 = scmp.lt.s32.totalorder %s441_s2, %s437_s25 }
  0x2d   :  { %p444_p8 = por %p443_p7, %p442_p6 }
  0x2f   :  { %p445_p9 = pnand %p444_p8, %p438_p5 }
  0x31   :  { %448 = shalt.err (!%p445_p9)
}
  0x32   :  { %58 = dma.hbm_to_vmem [thread:$0]  %s604_s6, 16, %s56_s15, [#allocation5]  }
  0x33   :  { %449 = dma.done.wait [#allocation3], 256  }
  0x34   :  { %450 = vsyncadd [#allocation3], 4294967040 }
  0x35   :  { %451 = dma.done.wait [#allocation5], 272  }
  0x36   :  { %452 = vsyncadd [#allocation5], 4294967024  ;;  %v458_v0 = vmov 0.0   ;;  %vm459_vm0 = vmmov 0   ;;  %v377_v1 = vld [vmem:[%s599_s1] sm:$0xff]   ;;  %v378_v2 = vld [vmem:[%s599_s1 + $0x8] sm:$0xff]  }
  0x37   :  { %346 = vmatprep.subr.bf16.mxu0 %v458_v0  ;;  %354 = vmatprep.subr.bf16.mxu1 %v458_v0  ;;  %v379_v3 = vld [vmem:[#allocation2] sm:$0xff]   ;;  %v70_v5 = vld [vmem:[%s598_s0 + $0x8] sm:$0xff]  ;;  %vm95_vm1 = vcmask 261120   ;;  %v380_v8 = vld [vmem:[#allocation4] sm:$0xff]   ;;  %vm148_vm2 = vcmask 257024  }
  0x38   :  { %350 = vmatprep.mubr.msk.bf16.mxu0 %vm459_vm0, %v458_v0  ;;  %358 = vmatprep.mubr.msk.bf16.mxu1 %vm459_vm0, %v458_v0  ;;  %v69_v4 = vld [vmem:[%s598_s0] sm:$0xff]  ;;  %v381_v7 = vld [vmem:[#allocation2 + $0x8] sm:$0xff]   ;;  %v382_v9 = vld [vmem:[#allocation4 + $0x8] sm:$0xff]  }
  0x39   :  { %347 = vmatpush3.bf16.msra.mxu0 %v377_v1  ;;  %355 = vmatpush3.bf16.msra.mxu1 %v379_v3  ;;  %v71_v6 = vpack.c.bf16 %v70_v5, %v69_v4  ;;  %v313_v10 = vld [vmem:[%s602_s4] ss:$0 sm:$0xff] }
  0x3a   :  { %348 = vmatprep.subr.bf16.mxu0 %v458_v0  ;;  %356 = vmatprep.subr.bf16.mxu1 %v458_v0  ;;  %v319_v12 = vld [vmem:[%s603_s5] ss:$0 sm:$0xff] }
  0x3b   :  { %v325_v27 = vld [vmem:[#allocation6] ss:$0 sm:$0xff] }
  0x3d   :  { %349 = vmatpush3.bf16.msra.mxu0 %v378_v2  ;;  %357 = vmatpush3.bf16.msra.mxu1 %v381_v7 }
  0x3e   :  { %362 = vmatprep.subr.bf16.mxu0 %v458_v0 }
  0x40   :  { %351 = vmatmul.mubr.msk.bf16.vlgmr.msra.gmra.mrb[0].mxu0 %vm95_vm1, %v71_v6  ;;  %359 = vmatmul.mubr.msk.bf16.vlgmr.msra.gmra.mrb[0].mxu1 %vm95_vm1, %v71_v6 }
  0x41   :  { %363 = vmatpush3.bf16.msra.mxu0 %v380_v8  ;;  %366 = vmatprep.mubr.msk.bf16.mxu0 %vm459_vm0, %v458_v0 }
  0x42   :  { %364 = vmatprep.subr.bf16.mxu0 %v458_v0 }
  0x45   :  { %365 = vmatpush3.bf16.msra.mxu0 %v382_v9 }
  0x48   :  { %367 = vmatmul.mubr.msk.bf16.vlgmr.msra.gmra.mrb[4].mxu0 %vm95_vm1, %v71_v6 }
 0x113   :  { %v133_v11 = vpop.f32.mrb[0].mxu0  ;;  %v208_v16 = vpop.f32.mrb[0].mxu1 }
 0x114   :  { %v134_v13 = vadd.f32 %v313_v10, %v133_v11  ;;  %v352_v14 = vpop.f32.mrb[1].mxu0  ;;  %v209_v20 = vadd.f32 %v319_v12, %v208_v16  ;;  %v360_v21 = vpop.f32.mrb[1].mxu1 }
 0x115   :  { %v136_v15 = vpop.f32.mrb[2].mxu0  ;;  %v211_v22 = vpop.f32.mrb[2].mxu1 }
 0x116   :  { %v331_v17 = vpack.c.bf16 %v134_v13, %v134_v13  ;;  %v137_v18 = vadd.f32 %v313_v10, %v136_v15  ;;  %v353_v19 = vpop.f32.mrb[3].mxu0  ;;  %v333_v24 = vpack.c.bf16 %v209_v20, %v209_v20  ;;  %v212_v25 = vadd.f32 %v319_v12, %v211_v22  ;;  %v361_v26 = vpop.f32.mrb[3].mxu1 }
 0x118   :  { %149 = vst.msk [vmem:[%s605_s7] sm:$0xf] %vm148_vm2, %v331_v17  ;;  %v332_v23 = vpack.c.bf16 %v137_v18, %v137_v18  ;;  %223 = vst.msk [vmem:[%s606_s8] sm:$0xf] %vm148_vm2, %v333_v24  ;;  %v334_v28 = vpack.c.bf16 %v212_v25, %v212_v25 }
 0x11a   :  { %150 = vst.msk [vmem:[%s605_s7 + $0x4] sm:$0xf] %vm148_vm2, %v332_v23  ;;  %224 = vst.msk [vmem:[%s606_s8 + $0x4] sm:$0xf] %vm148_vm2, %v334_v28 }
 0x11b   :  { %v282_v29 = vpop.f32.mrb[4].mxu0 }
 0x11c   :  { %v283_v30 = vadd.f32 %v325_v27, %v282_v29  ;;  %v368_v31 = vpop.f32.mrb[5].mxu0 }
 0x11d   :  { %v285_v32 = vpop.f32.mrb[6].mxu0 }
 0x11e   :  { %v335_v33 = vpack.c.bf16 %v283_v30, %v283_v30  ;;  %v286_v34 = vadd.f32 %v325_v27, %v285_v32  ;;  %v369_v35 = vpop.f32.mrb[7].mxu0 }
 0x120   :  { %297 = vst.msk [vmem:[%s607_s9] sm:$0xf] %vm148_vm2, %v335_v33  ;;  %v336_v36 = vpack.c.bf16 %v286_v34, %v286_v34 }
 0x122   :  { %298 = vst.msk [vmem:[%s607_s9 + $0x4] sm:$0xf] %vm148_vm2, %v336_v36 }
 0x123   :  { %311 = vsyncpa [#allocation3], 1 }
 0x124   :  { %312 = vsyncpa [#allocation5], 1 }

// kernel: _lambda_.3
= control target key start
LH: loop header
LB: loop body
LE: loop exit
PB: predicated region body
PF: predicated region fallthrough
CT: control target
= control target key end

     0   :  { %11 = vsyncpa [#allocation6], 0  ;;  %s1781_s0 = inlined_call_operand.vmem [shape: bf16[2,4,8,8], index: 0, kind: input, shape index: {}]   ;;  %s1782_s1 = inlined_call_operand.vmem [shape: bf16[2,4,8,8], index: 1, kind: input, shape index: {}]   ;;  %s1783_s2 = inlined_call_operand.vmem [shape: bf16[2,4,8,8], index: 2, kind: input, shape index: {}]   ;;  %s1784_s3 = inlined_call_operand.vmem [shape: f32[2,1,8], index: 3, kind: input, shape index: {}]   ;;  %s1785_s4 = inlined_call_operand.vmem [shape: bf16[32,32], index: 4, kind: input, shape index: {}]   ;;  %s1786_s5 = inlined_call_operand.vmem [shape: f32[1,32], index: 5, kind: input, shape index: {}]   ;;  %s1787_s6 = inlined_call_operand.hbm [shape: f32[2,8,32], index: 6, kind: output, shape index: {}]  }
   0x1   :  { %13 = vsyncpa [#allocation6 + $0x1], 0  ;;  %s1508_s21 = smov 0   ;;  %s1510_s22 = smov 0  }
   0x2   :  { %s1512_s23 = smov 0   ;;  %s1514_s24 = smov 0  }
   0x3   :  { %s1516_s25 = smov 0   ;;  %s1518_s26 = smov 0  }
   0x4 LB: > { %s1189_s27 = sadd.s32 4294967295, %s1463_s26   ;;  %s1190_s28 = sadd.s32 4294967294, %s1463_s26   ;;  %s1463_s26 = sphi %s1518_s26, %s19_s26   ;;  %s1459_s25 = sphi %s1516_s25, %s1794_s25   ;;  %s1455_s24 = sphi %s1514_s24, %s1793_s24   ;;  %s1451_s23 = sphi %s1512_s23, %s1792_s23   ;;  %s1447_s22 = sphi %s1510_s22, %s1791_s22   ;;  %s1443_s21 = sphi %s1508_s21, %s1790_s21  }
   0x5   : > { %s38_s29 = sadd.s32 1, %s1459_s25  ;;  %s201_s30 = sadd.s32 1, %s1451_s23 }
   0x6   : > { %p40_p0 = scmp.ge.s32.totalorder %s38_s29, 2  ;;  %p211_p1 = scmp.ne.s32.totalorder %s1451_s23, %s1447_s22 }
   0x7   : > { %p212_p2 = scmp.eq.s32.totalorder %s1189_s27, 1  ;;  %p217_p3 = scmp.ne.s32.totalorder %s1447_s22, %s1443_s21 }
   0x8   : > { %s1796_s29 = smov (%p40_p0, %s38_s29), 0  ;;  %p218_p5 = scmp.eq.s32.totalorder %s1190_s28, 1 }
   0x9   : > { %p1548_p4 = por %p212_p2, %p211_p1  ;;  %s196_s8 = ssub.s32 %s1459_s25, %s1796_s29 }
   0xa   : > { %p1193_p6 = scmp.ge.s32.totalorder %s1463_s26, 1  ;;  %p199_p7 = scmp.eq.s32.totalorder %s196_s8, 0 }
   0xb   : > { %p1555_p8 = por %p218_p5, %p217_p3  ;;  %p284_p9 = scmp.lt.s32.totalorder %s1463_s26, 3 }
   0xc   : > { %s1561_s10 = scalar_select %p199_p7, %s1451_s23, %s201_s30  }
   0xd   : > { %p285_p10 = pnand %p1193_p6, %p284_p9 }
   0xe   : > { %p339_p11 = scmp.lt.s32.totalorder (!%p285_p10), %s1455_s24, 1  ;;  %vm383_vm0 = vcmask (!%p285_p10), 64512   ;;  %v1465_v0 = vmov (!%p285_p10), 0.0   ;;  %vm1466_vm1 = vmmov (!%p285_p10), 0   ;;  %vm374_vm2 = vcmask (!%p285_p10), 7168   ;;  %s1470_s16 = smov (!%p285_p10), 16  }
   0xf   : > { %288 = sbr.rel (%p285_p10) target bundleno = 1191 (0x4a7), region = 44  ;;  %1239 = vmatprep.subr.bf16.mxu0 (!%p285_p10), %v1465_v0  ;;  %384 = vst.msk [vmem:[#allocation4] sm:$0xff] (!%p285_p10), %vm383_vm0, %v1465_v0  ;;  %385 = vst.msk [vmem:[#allocation4 + $0x8] sm:$0xff] (!%p285_p10), %vm383_vm0, %v1465_v0  ;;  %1245 = vmatprep.subr.bf16.mxu1 (!%p285_p10), %v1465_v0  ;;  %v1467_v13 = vmov (!%p285_p10), -inf   ;;  %v593_v14 = vlaneseq (!%p285_p10)  ;;  %v1468_v48 = vmov (!%p285_p10), 0   ;;  %vm730_vm4 = vcmask (!%p285_p10), 1043456  }
  0x10   : > { %386 = vst.msk [vmem:[#allocation4 + $0x10] sm:$0xff] (!%p285_p10), %vm383_vm0, %v1465_v0  ;;  %387 = vst.msk [vmem:[#allocation4 + $0x18] sm:$0xff] (!%p285_p10), %vm383_vm0, %v1465_v0  ;;  %1241 = vmatprep.mubr.msk.bf16.mxu0 (!%p285_p10), %vm1466_vm1, %v1465_v0  ;;  %1247 = vmatprep.mubr.msk.bf16.mxu1 (!%p285_p10), %vm1466_vm1, %v1465_v0  ;;  %s1471_s17 = smov (!%p285_p10), 24   ;;  %vm976_vm5 = vcmask (!%p285_p10), 130048   ;;  %vm978_vm6 = vcmask (!%p285_p10), 195584   ;;  %vm1004_vm7 = vcmask (!%p285_p10), 261120  }
  0x11   : > { %375 = vst.msk [vmem:[#allocation2] sm:$0xff] (!%p285_p10), %vm374_vm2, %v1467_v13  ;;  %376 = vst.msk [vmem:[#allocation2 + $0x8] sm:$0xff] (!%p285_p10), %vm374_vm2, %v1467_v13  ;;  %v594_v16 = vshrl.u32 (!%p285_p10), %v593_v14, 7  ;;  %1357 = vset.pattern.permute.xlu0 (!%p285_p10), %v1468_v48  ;;  %1358 = vset.pattern.permute.xlu1 (!%p285_p10), %v1468_v48  ;;  %s1214_s28 = sshll.u32 (!%p285_p10), %s1455_s24, 7 }
  0x12   : > { %377 = vst.msk [vmem:[#allocation2 + $0x10] sm:$0xff] (!%p285_p10), %vm374_vm2, %v1467_v13  ;;  %378 = vst.msk [vmem:[#allocation2 + $0x18] sm:$0xff] (!%p285_p10), %vm374_vm2, %v1467_v13  ;;  %s1733_s13 = scalar_lea.hbm (!%p285_p10), %s1787_s6, %s1214_s28 }
  0x13   : > { %379 = vst.msk [vmem:[#allocation3] sm:$0xff] (!%p285_p10), %vm374_vm2, %v1465_v0  ;;  %380 = vst.msk [vmem:[#allocation3 + $0x8] sm:$0xff] (!%p285_p10), %vm374_vm2, %v1465_v0  ;;  %v595_v17 = vsub.s32 (!%p285_p10), 0, %v594_v16 }
  0x14   : > { %381 = vst.msk [vmem:[#allocation3 + $0x10] sm:$0xff] (!%p285_p10), %vm374_vm2, %v1465_v0  ;;  %382 = vst.msk [vmem:[#allocation3 + $0x18] sm:$0xff] (!%p285_p10), %vm374_vm2, %v1465_v0 }
  0x16   : > { %s1575_s11 = scalar_select %p339_p11, %s1455_s24, 1 }
  0x18   : > { %s1582_s12 = sshll.u32 %s1575_s11, 4  ;;  %s368_s27 = scalar_lea.vmem %s1784_s3, %s1575_s11  ;;  %v1639_v49 = vld [vmem:[#allocation2] sm:$0xff]  ;;  %v1644_v52 = vld [vmem:[#allocation2 + $0x8] sm:$0xff] }
  0x19   : > { %s354_s15 = scalar_lea.vmem %s1782_s1, %s1582_s12  ;;  %s346_s18 = scalar_lea.vmem %s1781_s0, %s1582_s12  ;;  %v589_v15 = vld [vmem:[%s368_s27] sm:$0x1]  ;;  %v1654_v56 = vld [vmem:[#allocation2 + $0x10] sm:$0xff]  ;;  %v1664_v60 = vld [vmem:[#allocation2 + $0x18] sm:$0xff] }
  0x1a   : > { %v392_v1 = vld [vmem:[%s354_s15] sm:$0xf]  ;;  %v393_v2 = vld [vmem:[%s354_s15 + $0x4] sm:$0xf]  ;;  %v394_v5 = vld [vmem:[%s354_s15 + $0x8] sm:$0xf]  ;;  %s362_s8 = scalar_lea.vmem %s1783_s2, %s1582_s12 }
  0x1b   : > { %v405_v3 = vsel %vm383_vm0, %v392_v1, 0  ;;  %v451_v4 = vsel %vm383_vm0, %v393_v2, 0  ;;  %v395_v6 = vld [vmem:[%s354_s15 + $0xc] sm:$0xf]  ;;  %v388_v7 = vld [vmem:[%s346_s18] sm:$0xf] }
  0x1c   : > { %1240 = vmatpush3.bf16.xpose.msra.mxu0 %v405_v3  ;;  %1246 = vmatpush3.bf16.xpose.msra.mxu1 %v451_v4  ;;  %v389_v8 = vld [vmem:[%s346_s18 + $0x4] sm:$0xf]  ;;  %v497_v9 = vsel %vm383_vm0, %v394_v5, 0  ;;  %v543_v10 = vsel %vm383_vm0, %v395_v6, 0  ;;  %v390_v11 = vld [vmem:[%s346_s18 + $0x8] sm:$0xf] }
  0x1d   : > { %1251 = vmatprep.subr.bf16.mxu0 %v1465_v0  ;;  %1257 = vmatprep.subr.bf16.mxu1 %v1465_v0  ;;  %v391_v12 = vld [vmem:[%s346_s18 + $0xc] sm:$0xf]  ;;  %vm590_vm3 = vcmp.eq.f32.partialorder %v589_v15, 0.0  ;;  %v396_v2 = vld [vmem:[%s362_s8] sm:$0xf]  ;;  %v669_v48 = vld [vmem:[#allocation3 + $0x18] sm:$0xff] }
  0x1e   : > { %v591_v18 = vsel %vm590_vm3, -1e+09, %v1465_v0  ;;  %v732_v3 = vsel %vm730_vm4, %v396_v2, 0  ;;  %v397_v4 = vld [vmem:[%s362_s8 + $0x4] sm:$0xf]  ;;  %s1469_s15 = smov 8  }
  0x1f   : > { %v596_v19 = vrot.slane %v591_v18, %v595_v17  ;;  %v778_v5 = vsel %vm730_vm4, %v397_v4, 0  ;;  %v398_v6 = vld [vmem:[%s362_s8 + $0x8] sm:$0xf]  ;;  %s336_s18 = sand.u32 1, %s1447_s22  }
  0x20   : > { %s1194_s19 = sshll.u32 %s336_s18, 3  ;;  %s1050_s24 = scalar_lea.sflag [#allocation6], %s336_s18 }
  0x21   : > { %s338_s30 = scalar_lea.vmem [#allocation5], %s1194_s19 }
  0x23   : > { %1242 = vmatmul.mubr.msk.bf16.vlgmr.msra.gmra.mrb[0].mxu0 %vm383_vm0, %v388_v7  ;;  %1248 = vmatmul.mubr.msk.bf16.vlgmr.msra.gmra.mrb[0].mxu1 %vm383_vm0, %v389_v8  ;;  %v824_v7 = vsel %vm730_vm4, %v398_v6, 0  ;;  %v399_v8 = vld [vmem:[%s362_s8 + $0xc] sm:$0xf]  ;;  %s1064_s8 = sshll.u32 %s338_s30, 4  ;;  %s1735_s8 = int_to_ptr.vmem [resolvable:$true] %s1064_s8 }
  0x24   : > { %1252 = vmatpush3.bf16.xpose.msra.mxu0 %v497_v9  ;;  %1258 = vmatpush3.bf16.xpose.msra.mxu1 %v543_v10  ;;  %v870_v9 = vsel %vm730_vm4, %v399_v8, 0  ;;  %s1385_s14 = scalar_lea.vmem %s1735_s8, 128 }
  0x25   : > { %1253 = vmatprep.mubr.msk.bf16.mxu0 %vm1466_vm1, %v1465_v0  ;;  %1259 = vmatprep.mubr.msk.bf16.mxu1 %vm1466_vm1, %v1465_v0  ;;  %p1386_p12 = scmp.ne.s32.totalorder %s1735_s8, %s1385_s14 }
  0x26   : > { %1263 = vmatprep.subr.bf16.mxu0 %v1465_v0  ;;  %1269 = vmatprep.subr.bf16.mxu1 %v1465_v0 }
  0x27   : > { %p1387_p13 = pnand %p1386_p12, %p1548_p4 }
  0x29   : > { %p1388_p0 = pneg %p1387_p13 }
  0x2b   : > { %1254 = vmatmul.mubr.msk.bf16.vlgmr.msra.gmra.mrb[4].mxu0 %vm383_vm0, %v390_v11  ;;  %1260 = vmatmul.mubr.msk.bf16.vlgmr.msra.gmra.mrb[4].mxu1 %vm383_vm0, %v391_v12 }
  0x2c   : > { %1265 = vmatprep.mubr.msk.bf16.mxu0 %vm1466_vm1, %v1465_v0  ;;  %1271 = vmatprep.mubr.msk.bf16.mxu1 %vm1466_vm1, %v1465_v0 }
  0x2d   : > { %1264 = vmatpush3.bf16.msra.mxu0 %v732_v3  ;;  %1270 = vmatpush3.bf16.msra.mxu1 %v778_v5  ;;  %v696_v3 = vld [vmem:[#allocation4 + $0x8] sm:$0xff] }
  0x2e   : > { %1275 = vmatprep.subr.bf16.mxu0 %v1465_v0  ;;  %1281 = vmatprep.subr.bf16.mxu1 %v1465_v0 }
  0xf6   : > { %v441_v20 = vpop.f32.mrb[0].mxu0  ;;  %v487_v21 = vpop.f32.mrb[0].mxu1 }
  0xf7   : > { %v585_v22 = vmul.f32 0.35355338, %v441_v20  ;;  %v1243_v23 = vpop.f32.mrb[1].mxu0  ;;  %v586_v24 = vmul.f32 0.35355338, %v487_v21  ;;  %v1249_v25 = vpop.f32.mrb[1].mxu1 }
  0xf8   : > { %v444_v26 = vpop.f32.mrb[2].mxu0  ;;  %v490_v27 = vpop.f32.mrb[2].mxu1 }
  0xf9   : > { %v1244_v28 = vpop.f32.mrb[3].mxu0  ;;  %v1250_v29 = vpop.f32.mrb[3].mxu1  ;;  %v1629_v30 = vadd.f32 %v596_v19, %v585_v22  ;;  %v1631_v31 = vadd.f32 %v596_v19, %v586_v24 }
  0xfb   : > { %v606_v32 = vsel %vm383_vm0, %v1629_v30, -inf  ;;  %v609_v33 = vsel %vm383_vm0, %v1631_v31, -inf }
  0xfc   : > { %607 = vmax.xlane.f32.xlu0 %v606_v32 }
  0xfe   : > { %v533_v34 = vpop.f32.mrb[4].mxu0  ;;  %v579_v35 = vpop.f32.mrb[4].mxu1 }
  0xff   : > { %v587_v36 = vmul.f32 0.35355338, %v533_v34  ;;  %v1255_v37 = vpop.f32.mrb[5].mxu0  ;;  %v588_v38 = vmul.f32 0.35355338, %v579_v35  ;;  %v1261_v39 = vpop.f32.mrb[5].mxu1 }
 0x100   : > { %610 = vmax.xlane.f32.xlu0 %v609_v33  ;;  %v536_v40 = vpop.f32.mrb[6].mxu0  ;;  %v582_v41 = vpop.f32.mrb[6].mxu1 }
 0x101   : > { %v1256_v42 = vpop.f32.mrb[7].mxu0  ;;  %v1262_v43 = vpop.f32.mrb[7].mxu1  ;;  %v600_v44 = vadd.f32 %v596_v19, %v587_v36  ;;  %v601_v45 = vadd.f32 %v596_v19, %v588_v38  ;;  %v667_v41 = vld [vmem:[#allocation3 + $0x8] sm:$0xff] }
 0x103   : > { %v612_v46 = vsel %vm383_vm0, %v600_v44, -inf  ;;  %v615_v47 = vsel %vm383_vm0, %v601_v45, -inf }
 0x104   : > { %613 = vmax.xlane.f32.xlu1 %v612_v46 }
 0x108   : > { %616 = vmax.xlane.f32.xlu1 %v615_v47 }
 0x189   : > { %v608_v50 = vpop.xlane.xlu0 %607 }
 0x18a   : > { %v1642_v51 = vmax.f32 %v1639_v49, %v608_v50 }
 0x18c   : > { %v622_v53 = vsub.f32 %v1639_v49, %v1642_v51  ;;  %920 = vst.msk [vmem:[#allocation2] sm:$0xff] %vm374_vm2, %v1642_v51  ;;  %636 = vperm.xlu0 %1357, %v1642_v51  }
 0x18d   : > { %v611_v54 = vpop.xlane.xlu0 %610 }
 0x18e   : > { %v1652_v55 = vmax.f32 %v1644_v52, %v611_v54  ;;  %v626_v40 = vmul.f32 1.442695, %v622_v53 }
 0x190   : > { %v623_v57 = vsub.f32 %v1644_v52, %v1652_v55  ;;  %921 = vst.msk [vmem:[#allocation2 + $0x8] sm:$0xff] %vm374_vm2, %v1652_v55  ;;  %641 = vperm.xlu1 %1358, %v1652_v55  }
 0x191   : > { %v614_v58 = vpop.xlane.xlu1 %613 }
 0x192   : > { %v1662_v59 = vmax.f32 %v1654_v56, %v614_v58  ;;  %v628_v35 = vmul.f32 1.442695, %v623_v57 }
 0x194   : > { %v624_v61 = vsub.f32 %v1654_v56, %v1662_v59  ;;  %922 = vst.msk [vmem:[#allocation2 + $0x10] sm:$0xff] %vm374_vm2, %v1662_v59  ;;  %646 = vperm.xlu1 %1358, %v1662_v59   ;;  %v666_v56 = vld [vmem:[#allocation3] sm:$0xff] }
 0x195   : > { %v617_v62 = vpop.xlane.xlu1 %616 }
 0x196   : > { %v1672_v63 = vmax.f32 %v1664_v60, %v617_v62  ;;  %v630_v33 = vmul.f32 1.442695, %v624_v61 }
 0x198   : > { %v625_v1 = vsub.f32 %v1664_v60, %v1672_v63  ;;  %923 = vst.msk [vmem:[#allocation2 + $0x18] sm:$0xff] %vm374_vm2, %v1672_v63  ;;  %651 = vperm.xlu1 %1358, %v1672_v63  }
 0x19a   : > { %v632_v36 = vmul.f32 1.442695, %v625_v1 }
 0x20b   : > { %v637_v10 = vpop.permute.xlu0 %636 }
 0x20c   : > { %v654_v11 = vsub.f32 %v1629_v30, %v637_v10  ;;  %v697_v10 = vld [vmem:[#allocation4 + $0x10] sm:$0xff] }
 0x20e   : > { %v658_v12 = vmul.f32 1.442695, %v654_v11 }
 0x20f   : > { %v642_v13 = vpop.permute.xlu1 %641 }
 0x210   : > { %1361 = vpow2.f32 %v658_v12  ;;  %v655_v14 = vsub.f32 %v1631_v31, %v642_v13 }
 0x212   : > { %v660_v15 = vmul.f32 1.442695, %v655_v14 }
 0x213   : > { %v647_v16 = vpop.permute.xlu1 %646 }
 0x214   : > { %1363 = vpow2.f32 %v660_v15  ;;  %v656_v17 = vsub.f32 %v600_v44, %v647_v16  ;;  %v668_v44 = vld [vmem:[#allocation3 + $0x10] sm:$0xff] }
 0x216   : > { %v662_v18 = vmul.f32 1.442695, %v656_v17 }
 0x217   : > { %v652_v19 = vpop.permute.xlu1 %651 }
 0x218   : > { %1365 = vpow2.f32 %v662_v18  ;;  %v657_v20 = vsub.f32 %v601_v45, %v652_v19  ;;  %v698_v18 = vld [vmem:[#allocation4 + $0x18] sm:$0xff] }
 0x21a   : > { %v1362_v21 = vpop.eup %1361  ;;  %v664_v22 = vmul.f32 1.442695, %v657_v20 }
 0x21b   : > { %v723_v23 = vpack.c.bf16 %v1362_v21, %v1362_v21  ;;  %v674_v34 = vsel %vm383_vm0, %v1362_v21, 0.0 }
 0x21c   : > { %1367 = vpow2.f32 %v664_v22 }
 0x21d   : > { %1266 = vmatmul.mubr.msk.bf16.vlgmr.msra.gmra.mrb[8].mxu0 %vm383_vm0, %v723_v23  ;;  %1369 = vpow2.f32 %v630_v33 }
 0x21e   : > { %v1364_v24 = vpop.eup %1363  ;;  %1276 = vmatpush3.bf16.msra.mxu0 %v824_v7  ;;  %1277 = vmatprep.mubr.msk.bf16.mxu0 %vm1466_vm1, %v1465_v0  ;;  %1371 = vpow2.f32 %v628_v35 }
 0x21f   : > { %v677_v25 = vsel %vm383_vm0, %v1364_v24, 0.0  ;;  %v724_v26 = vpack.c.bf16 %v1364_v24, %v1364_v24  ;;  %1287 = vmatprep.subr.bf16.mxu0 %v1465_v0  ;;  %1373 = vpow2.f32 %v632_v36 }
 0x220   : > { %678 = vadd.xlane.f32.xlu1 %v677_v25  ;;  %1375 = vpow2.f32 %v626_v40 }
 0x221   : > { %1272 = vmatmul.mubr.msk.bf16.vlgmr.msra.gmra.mrb[8].mxu1 %vm383_vm0, %v724_v26 }
 0x222   : > { %v1366_v27 = vpop.eup %1365  ;;  %1282 = vmatpush3.bf16.msra.mxu1 %v870_v9  ;;  %1283 = vmatprep.mubr.msk.bf16.mxu1 %vm1466_vm1, %v1465_v0 }
 0x223   : > { %v680_v28 = vsel %vm383_vm0, %v1366_v27, 0.0  ;;  %v725_v29 = vpack.c.bf16 %v1366_v27, %v1366_v27 }
 0x224   : > { %681 = vadd.xlane.f32.xlu0 %v680_v28 }
 0x225   : > { %1278 = vmatmul.mubr.msk.bf16.vlgmr.msra.gmra.mrb[12].mxu0 %vm383_vm0, %v725_v29 }
 0x226   : > { %v1368_v30 = vpop.eup %1367  ;;  %1291 = vmatprep.mubr.msk.bf16.mxu0 %vm1466_vm1, %v1465_v0 }
 0x227   : > { %v683_v31 = vsel %vm383_vm0, %v1368_v30, 0.0  ;;  %v726_v32 = vpack.c.bf16 %v1368_v30, %v1368_v30  ;;  %v1370_v37 = vpop.eup %1369 }
 0x228   : > { %684 = vadd.xlane.f32.xlu1 %v683_v31  ;;  %v1372_v38 = vpop.eup %1371  ;;  %v672_v46 = vmul.f32 %v1370_v37, %v668_v44  ;;  %v1359_v31 = vld [vmem:[%s1785_s4] sm:$0xff]  }
 0x229   : > { %1284 = vmatmul.mubr.msk.bf16.vlgmr.msra.gmra.mrb[12].mxu1 %vm383_vm0, %v726_v32  ;;  %v1374_v39 = vpop.eup %1373  ;;  %v671_v42 = vmul.f32 %v1372_v38, %v667_v41  ;;  %1288 = vmatpush3.bf16.msra.mxu0 %v1359_v31  ;;  %v1360_v32 = vld [vmem:[%s1785_s4 + $0x8] sm:$0xff]  }
 0x22a   : > { %v673_v52 = vmul.f32 %v1374_v39, %v669_v48  ;;  %v1376_v54 = vpop.eup %1375  ;;  %1289 = vmatprep.subr.bf16.mxu0 %v1465_v0 }
 0x22b   : > { %v670_v53 = vmul.f32 %v1376_v54, %v666_v56 }
 0x22c   : > { %675 = vadd.xlane.f32.xlu1 %v674_v34 }
 0x22d   : > { %1290 = vmatpush3.bf16.msra.mxu0 %v1360_v32 }
 0x23a   : > { %711 = vperm.xlu0 %1357, %v1370_v37  }
 0x23d   : > { %706 = vperm.xlu1 %1358, %v1372_v38  }
 0x241   : > { %716 = vperm.xlu1 %1358, %v1374_v39   ;;  %v695_v39 = vld [vmem:[#allocation4] sm:$0xff] }
 0x2ad   : > { %v679_v43 = vpop.xlane.xlu1 %678 }
 0x2ae   : > { %v687_v45 = vadd.f32 %v679_v43, %v671_v42 }
 0x2b0   : > { %692 = vst.msk [vmem:[#allocation3 + $0x8] sm:$0xff] %vm374_vm2, %v687_v45 }
 0x2b1   : > { %v682_v47 = vpop.xlane.xlu0 %681 }
 0x2b2   : > { %v688_v50 = vadd.f32 %v682_v47, %v672_v46 }
 0x2b4   : > { %693 = vst.msk [vmem:[#allocation3 + $0x10] sm:$0xff] %vm374_vm2, %v688_v50 }
 0x2b5   : > { %v685_v55 = vpop.xlane.xlu1 %684 }
 0x2b6   : > { %v689_v49 = vadd.f32 %v685_v55, %v673_v52 }
 0x2b7   : > { %v932_v51 = vld [vmem:[#allocation3 + $0x8] sm:$0xff] }
 0x2b8   : > { %694 = vst.msk [vmem:[#allocation3 + $0x18] sm:$0xff] %vm374_vm2, %v689_v49  ;;  %1377 = vrcp.f32 %v932_v51  ;;  %v1209_v51 = vld [vmem:[%s1786_s5] ss:$0 sm:$0xff] }
 0x2b9   : > { %v676_v57 = vpop.xlane.xlu1 %675  ;;  %v712_v11 = vpop.permute.xlu0 %711 }
 0x2ba   : > { %v686_v58 = vadd.f32 %v676_v57, %v670_v53  ;;  %v721_v16 = vmul.f32 %v712_v11, %v697_v10 }
 0x2bb   : > { %v933_v59 = vld [vmem:[#allocation3 + $0x10] sm:$0xff] }
 0x2bc   : > { %691 = vst.msk [vmem:[#allocation3] sm:$0xff] %vm374_vm2, %v686_v58  ;;  %1379 = vrcp.f32 %v933_v59 }
 0x2bd   : > { %v707_v4 = vpop.permute.xlu1 %706 }
 0x2be   : > { %v720_v8 = vmul.f32 %v707_v4, %v696_v3 }
 0x2bf   : > { %v934_v60 = vld [vmem:[#allocation3 + $0x18] sm:$0xff] }
 0x2c0   : > { %1381 = vrcp.f32 %v934_v60 }
 0x2c1   : > { %v717_v19 = vpop.permute.xlu1 %716 }
 0x2c2   : > { %v1378_v61 = vpop.eup %1377  ;;  %v722_v24 = vmul.f32 %v717_v19, %v698_v18 }
 0x2c3   : > { %946 = vperm.xlu1 %1358, %v1378_v61   ;;  %v931_v62 = vld [vmem:[#allocation3] sm:$0xff] }
 0x2c4   : > { %1383 = vrcp.f32 %v931_v62 }
 0x2c6   : > { %v1380_v63 = vpop.eup %1379 }
 0x2c7   : > { %951 = vperm.xlu1 %1358, %v1380_v63  }
 0x2ca   : > { %v1382_v1 = vpop.eup %1381 }
 0x2cb   : > { %701 = vperm.xlu1 %1358, %v1376_v54   ;;  %956 = vperm.xlu0 %1357, %v1382_v1  }
 0x2ce   : > { %v1384_v2 = vpop.eup %1383 }
 0x2cf   : > { %941 = vperm.xlu0 %1357, %v1384_v2  }
 0x2f0   : > { %v768_v5 = vpop.f32.mrb[8].mxu0 }
 0x2f1   : > { %v1267_v6 = vpop.f32.mrb[9].mxu0 }
 0x2f2   : > { %v771_v7 = vpop.f32.mrb[10].mxu0 }
 0x2f3   : > { %v1268_v9 = vpop.f32.mrb[11].mxu0 }
 0x2f4   : > { %v814_v12 = vpop.f32.mrb[8].mxu1 }
 0x2f5   : > { %v913_v13 = vadd.f32 %v814_v12, %v720_v8  ;;  %v1273_v14 = vpop.f32.mrb[9].mxu1 }
 0x2f6   : > { %v817_v15 = vpop.f32.mrb[10].mxu1 }
 0x2f7   : > { %917 = vst.msk [vmem:[#allocation4 + $0x8] sm:$0xff] %vm383_vm0, %v913_v13  ;;  %v1274_v17 = vpop.f32.mrb[11].mxu1 }
 0x2f8   : > { %v860_v20 = vpop.f32.mrb[12].mxu0 }
 0x2f9   : > { %v914_v21 = vadd.f32 %v860_v20, %v721_v16  ;;  %v1279_v22 = vpop.f32.mrb[13].mxu0 }
 0x2fa   : > { %v863_v23 = vpop.f32.mrb[14].mxu0 }
 0x2fb   : > { %918 = vst.msk [vmem:[#allocation4 + $0x10] sm:$0xff] %vm383_vm0, %v914_v21  ;;  %v1280_v25 = vpop.f32.mrb[15].mxu0 }
 0x2fc   : > { %v906_v26 = vpop.f32.mrb[12].mxu1 }
 0x2fd   : > { %v915_v27 = vadd.f32 %v906_v26, %v722_v24  ;;  %v1285_v28 = vpop.f32.mrb[13].mxu1 }
 0x2fe   : > { %v909_v29 = vpop.f32.mrb[14].mxu1  ;;  %v928_v33 = vld [vmem:[#allocation4 + $0x8] sm:$0xff] }
 0x2ff   : > { %919 = vst.msk [vmem:[#allocation4 + $0x18] sm:$0xff] %vm383_vm0, %v915_v27  ;;  %v1286_v30 = vpop.f32.mrb[15].mxu1 }
 0x302   : > { %v929_v37 = vld [vmem:[#allocation4 + $0x10] sm:$0xff] }
 0x306   : > { %v930_v41 = vld [vmem:[#allocation4 + $0x18] sm:$0xff] }
 0x342   : > { %v947_v34 = vpop.permute.xlu1 %946 }
 0x343   : > { %v960_v35 = vmul.f32 %v947_v34, %v928_v33 }
 0x345   : > { %964 = vrot.lane.b32.xlu1 %v960_v35, %s1469_s15  ;;  %s1472_s15 = smov [#allocation5]  }
 0x346   : > { %v952_v36 = vpop.permute.xlu1 %951 }
 0x347   : > { %v961_v38 = vmul.f32 %v952_v36, %v929_v37 }
 0x349   : > { %968 = vrot.lane.b32.xlu0 %v961_v38, %s1470_s16  ;;  %s1389_s16 = sshll.u32 %s1472_s15, 4  ;;  %s1390_s16 = int_to_ptr.vmem [resolvable:$false] %s1389_s16 }
 0x34a   : > { %v957_v40 = vpop.permute.xlu0 %956  ;;  %v702_v42 = vpop.permute.xlu1 %701  ;;  %p1392_p1 = scmp.lt.s32.totalorder %s1735_s8, %s1390_s16 }
 0x34b   : > { %v962_v0 = vmul.f32 %v957_v40, %v930_v41  ;;  %v719_v43 = vmul.f32 %v702_v42, %v695_v39 }
 0x34d   : > { %v912_v44 = vadd.f32 %v768_v5, %v719_v43  ;;  %972 = vrot.lane.b32.xlu1 %v962_v0, %s1471_s17  ;;  %s1391_s17 = scalar_lea.vmem %s1390_s16, 256 }
 0x34e   : > { %v942_v45 = vpop.permute.xlu0 %941  ;;  %p1393_p2 = scmp.lt.s32.totalorder %s1391_s17, %s1385_s14 }
 0x34f   : > { %916 = vst.msk [vmem:[#allocation4] sm:$0xff] %vm383_vm0, %v912_v44 }
 0x350   : > { %p1394_p3 = por %p1393_p2, %p1392_p1 }
 0x352   : > { %p1395_p5 = pnand %p1394_p3, %p1388_p0 }
 0x356   : > { %v927_v46 = vld [vmem:[#allocation4] sm:$0xff] }
 0x357   : > { %v959_v48 = vmul.f32 %v942_v45, %v927_v46 }
 0x3b7   : > { %v965_v47 = vpop.permute.xlu1 %964 }
 0x3b8   : > { %v975_v52 = vsel %vm383_vm0, %v959_v48, %v965_v47 }
 0x3bb   : > { %v969_v50 = vpop.permute.xlu0 %968 }
 0x3bc   : > { %v977_v54 = vsel %vm976_vm5, %v975_v52, %v969_v50 }
 0x3bf   : > { %v973_v55 = vpop.permute.xlu1 %972 }
 0x3c0   : > { %v979_v56 = vsel %vm978_vm6, %v977_v54, %v973_v55 }
 0x3c1   : > { %v980_v49 = vpack.c.bf16 %v979_v56, %v979_v56 }
 0x3c3   : > { %1292 = vmatmul.mubr.msk.bf16.vlgmr.msra.gmra.mrb[16].mxu0 %vm1004_vm7, %v980_v49 }
 0x496   : > { %v1042_v53 = vpop.f32.mrb[16].mxu0 }
 0x497   : > { %v1043_v57 = vadd.f32 %v1209_v51, %v1042_v53  ;;  %v1293_v58 = vpop.f32.mrb[17].mxu0 }
 0x498   : > { %v1045_v59 = vpop.f32.mrb[18].mxu0 }
 0x499   : > { %v1294_v60 = vpop.f32.mrb[19].mxu0  ;;  %1048 = vst.msk [vmem:[%s338_s30] sm:$0xff] %vm1004_vm7, %v1043_v57 }
 0x49a   : > { %1398 = shalt.err (!%p1395_p5)
}
 0x49b   : > { %s1399_s18 = scalar_lea.hbm %s1733_s13, 128  ;;  %s1403_s27 = scalar_lea.hbm %s1787_s6, 256 }
 0x49c   : > { %p1400_p6 = scmp.ne.s32.totalorder %s1733_s13, %s1399_s18  ;;  %p1404_p10 = scmp.lt.u32.totalorder %s1733_s13, %s1787_s6 }
 0x49d   : > { %p1405_p11 = scmp.lt.u32.totalorder %s1403_s27, %s1399_s18  ;;  %p1407_p13 = scmp.lt.u32.totalorder %s1399_s18, %s1733_s13 }
 0x49e   : > { %p1401_p7 = pnand %p1400_p6, %p1548_p4 }
 0x49f   : > { %p1406_p12 = por %p1405_p11, %p1404_p10 }
 0x4a0   : > { %p1402_p9 = pneg %p1401_p7 }
 0x4a1   : > { %p1408_p0 = por %p1407_p13, %p1406_p12 }
 0x4a3   : > { %p1409_p1 = pnand %p1408_p0, %p1402_p9 }
 0x4a5   : > { %1412 = shalt.err (!%p1409_p1)
}
 0x4a6   : > { %1295 = dma.vmem_to_hbm [thread:$0]  (%p1548_p4), %s1735_s8, 128, %s1733_s13, %s1050_s24  }
 0x4a7 PF: > { %p1301_p2 = scmp.ge.s32.totalorder %s1463_s26, 2  ;;  %s1076_s11 = sand.u32 1, %s1443_s21  }
 0x4a8   : > { %s1077_s12 = scalar_lea.sflag [#allocation6], %s1076_s11 }
 0x4a9   : > { %p1298_p3 = pnand %p1301_p2, %p1555_p8 }
 0x4ab   : > { %1438 = dma.done.wait (!%p1298_p3), %s1077_s12, 128  }
 0x4ac   : > { %1440 = vsyncadd (!%p1298_p3), %s1077_s12, 4294967168  ;;  %s19_s26 = sadd.s32 1, %s1463_s26   ;;  %s1790_s21 = smov %s1447_s22 }
 0x4ad   : > { %p16_p5 = scmp.ge.s32.totalorder %s19_s26, 4   ;;  %s1791_s22 = smov %s1451_s23 }
 0x4ae   : > { %s1792_s23 = smov %s1561_s10  ;;  %s1793_s24 = smov %s1459_s25 }
 0x4af   : > { %s1794_s25 = smov %s1796_s29  ;;  %18 = sbr.rel (!%p16_p5) target bundleno = 4 (0x4), region = 96 }
 0x4b6   :  { %1082 = vsyncpa [#allocation6], 1 }
 0x4b7   :  { %1084 = vsyncpa [#allocation6 + $0x1], 1 }

</bundles_post_ra>
